<compile_context>
chip_gen: v7x
topology: tpu7x:2x2x1
jax: 0.10.0
libtpu: 0.0.40
codegen_flags: <defaults>
</compile_context>

<pallas_src>
import functools

import jax
import jax.numpy as jnp
from jax.experimental import pallas as pl
from jax.experimental.pallas import tpu as pltpu

# CIFAR-10 statistics (as in the reference module's usage)
CIFAR10_MEAN = [0.4914, 0.4822, 0.4465]
CIFAR10_STD = [0.2023, 0.1994, 0.201]

_ROW_TILE_TARGET = 256     # sublane axis (N*C rows)
_COL_TILE_TARGET = 4096    # lane axis (H*W), multiple of 128 -> unmasked vst
_LANE = 128


def _round_up(v, m):
    return ((v + m - 1) // m) * m


def _normalize_kernel(scale_ref, bias_ref, x_ref, o_ref, *, num_channels):
    """o = x * scale[row % C] + bias[row % C], accumulated in float32.

    scale_ref / bias_ref: (C,) float32 in SMEM.
    x_ref / o_ref:        (TR, TC) tile; rows = flattened N*C, cols = H*W.
    """
    tr = x_ref.shape[0]
    row0 = pl.program_id(0) * tr
    # Channel id of every row in this tile (2-D iota as required on TPU).
    ch = (jax.lax.broadcasted_iota(jnp.int32, (tr, 1), 0) + row0) % num_channels

    scale = jnp.full((tr, 1), scale_ref[0], dtype=jnp.float32)
    bias = jnp.full((tr, 1), bias_ref[0], dtype=jnp.float32)
    for c in range(1, num_channels):          # static, tiny (C == 3 typically)
        is_c = ch == c
        scale = jnp.where(is_c, scale_ref[c], scale)
        bias = jnp.where(is_c, bias_ref[c], bias)

    x = x_ref[...].astype(jnp.float32)
    o_ref[...] = (x * scale + bias).astype(o_ref.dtype)


def normalize(x, mean, std):
    """Pallas TPU implementation of (x - mean[None,:,None,None]) / std[None,:,None,None].

    x:    (N, C, H, W) float array (NCHW)
    mean: (C,) float array (or sequence)
    std:  (C,) float array (or sequence)
    """
    N, C, H, W = x.shape
    dtype = x.dtype
    rows, cols = N * C, H * W
    x2d = x.reshape(rows, cols)

    # Per-channel affine params, kept in float32 all the way into the kernel.
    scale = 1.0 / jnp.asarray(std, dtype=jnp.float32)        # (C,)
    bias = -jnp.asarray(mean, dtype=jnp.float32) * scale     # (C,)

    # dtype-aware sublane alignment: f32 -> 8, bf16/f16 -> 16, int8/fp8 -> 32.
    row_align = 8 * max(1, 4 // jnp.dtype(dtype).itemsize)

    # Fixed aligned tiles + cdiv grid (Pallas masks the ragged edge block).
    # No full-extent fallback: odd shapes can never request a VMEM-busting block.
    tr = min(_ROW_TILE_TARGET, _round_up(rows, row_align))
    tc = min(_COL_TILE_TARGET, _round_up(cols, _LANE))

    # Guarantee >= 2 grid steps when there is enough data: v7x has two
    # TensorCores, and ("parallel","parallel") only helps if the grid has work
    # to shard. Prefer splitting rows (keeps stores fully lane-dense).
    if pl.cdiv(rows, tr) * pl.cdiv(cols, tc) == 1:
        if rows > row_align:
            tr = _round_up(pl.cdiv(rows, 2), row_align)
        elif cols > _LANE:
            tc = _round_up(pl.cdiv(cols, 2), _LANE)
    grid = (pl.cdiv(rows, tr), pl.cdiv(cols, tc))

    smem_spec = pl.BlockSpec(memory_space=pltpu.MemorySpace.SMEM)

    out2d = pl.pallas_call(
        functools.partial(_normalize_kernel, num_channels=C),
        out_shape=jax.ShapeDtypeStruct((rows, cols), dtype),
        grid_spec=pltpu.PrefetchScalarGridSpec(
            num_scalar_prefetch=0,
            grid=grid,
            in_specs=[
                smem_spec,                                     # scale (C,) f32
                smem_spec,                                     # bias  (C,) f32
                pl.BlockSpec((tr, tc), lambda i, j: (i, j)),   # x tile
            ],
            out_specs=pl.BlockSpec((tr, tc), lambda i, j: (i, j)),
        ),
        compiler_params=pltpu.CompilerParams(
            dimension_semantics=("parallel", "parallel"),
            # 4 MiB f32 tiles -> ~16 MiB double-buffered residency; raise the
            # scoped limit so v5e (16 MiB default) also takes the bigger tiles.
            vmem_limit_bytes=32 * 1024 * 1024,
        ),
    )(scale, bias, x2d)

    return out2d.reshape(N, C, H, W)


def _check(x, mean, std):
    out = jax.block_until_ready(normalize(x, mean, std))
    ref = (x - mean[None, :, None, None]) / std[None, :, None, None]
    assert out.shape == ref.shape
    assert out.dtype == x.dtype
    assert jnp.allclose(out, ref, atol=1e-5, rtol=1e-5), "mismatch vs reference"


if __name__ == "__main__":
    key = jax.random.PRNGKey(0)
    mean = jnp.asarray(CIFAR10_MEAN, dtype=jnp.float32)
    std = jnp.asarray(CIFAR10_STD, dtype=jnp.float32)

    k1, k2, k3 = jax.random.split(key, 3)

    # Small NCHW input consistent with the module (3 channels, CIFAR stats).
    _check(jax.random.uniform(k1, (2, 3, 16, 16), dtype=jnp.float32), mean, std)
    # Larger input: exercises the multi-step tiled grid path.
    _check(jax.random.uniform(k2, (4, 3, 64, 64), dtype=jnp.float32), mean, std)
    # Ragged spatial extent (H*W not a multiple of 128): masked edge block path.
    _check(jax.random.uniform(k3, (2, 3, 15, 15), dtype=jnp.float32), mean, std)

    print("KERNEL_OK")
</pallas_src>

<mosaic_0001>
module attributes {stable_mosaic.version = 11 : i64} {
  func.func @_normalize_kernel(%arg0: i32, %arg1: i32, %arg2: memref<3xf32, #tpu.memory_space<smem>>, %arg3: memref<3xf32, #tpu.memory_space<smem>>, %arg4: memref<8x128xf32, #tpu.memory_space<vmem>>, %arg5: memref<8x128xf32, #tpu.memory_space<vmem>>) attributes {dimension_semantics = [#tpu.dimension_semantics<parallel>, #tpu.dimension_semantics<parallel>], iteration_bounds = array<i64: 1, 2>, scalar_prefetch = 0 : i64, scratch_operands = 0 : i64, tpu.core_type = #tpu.core_type<tc>, window_params = [{transform_indices = @transform_0, window_bounds = array<i64: 3>}, {transform_indices = @transform_1, window_bounds = array<i64: 3>}, {transform_indices = @transform_2, window_bounds = array<i64: 8, 128>}, {transform_indices = @transform_3, window_bounds = array<i64: 8, 128>}]} {
    %c8_i32 = arith.constant 8 : i32
    %0 = arith.muli %arg0, %c8_i32 : i32
    %1 = tpu.iota {dimensions = array<i32: 0>} : vector<8x1xi32>
    %2 = vector.broadcast %0 : i32 to vector<8x1xi32>
    %3 = arith.addi %1, %2 : vector<8x1xi32>
    %c3_i32 = arith.constant 3 : i32
    %c0_i32 = arith.constant 0 : i32
    %4 = arith.cmpi eq, %c3_i32, %c0_i32 : i32
    %c1_i32 = arith.constant 1 : i32
    %5 = arith.select %4, %c1_i32, %c3_i32 : i32
    %6 = vector.broadcast %5 : i32 to vector<8x1xi32>
    %7 = arith.remsi %3, %6 : vector<8x1xi32>
    %c0_i32_0 = arith.constant 0 : i32
    %8 = vector.broadcast %c0_i32_0 : i32 to vector<8x1xi32>
    %9 = arith.cmpi ne, %7, %8 : vector<8x1xi32>
    %c0_i32_1 = arith.constant 0 : i32
    %10 = vector.broadcast %c0_i32_1 : i32 to vector<8x1xi32>
    %11 = arith.cmpi slt, %7, %10 : vector<8x1xi32>
    %c0_i32_2 = arith.constant 0 : i32
    %12 = arith.cmpi slt, %5, %c0_i32_2 : i32
    %13 = vector.broadcast %12 : i1 to vector<8x1xi1>
    %14 = vector.broadcast %13 : vector<8x1xi1> to vector<8x1xi1>
    %15 = arith.xori %11, %14 : vector<8x1xi1>
    %16 = arith.andi %15, %9 : vector<8x1xi1>
    %17 = vector.broadcast %5 : i32 to vector<8x1xi32>
    %18 = arith.addi %7, %17 : vector<8x1xi32>
    %19 = arith.select %16, %18, %7 : vector<8x1xi1>, vector<8x1xi32>
    %c0 = arith.constant 0 : index
    %20 = memref.load %arg2[%c0] : memref<3xf32, #tpu.memory_space<smem>>
    %21 = vector.broadcast %20 : f32 to vector<8x1xf32>
    %c0_3 = arith.constant 0 : index
    %22 = memref.load %arg3[%c0_3] : memref<3xf32, #tpu.memory_space<smem>>
    %23 = vector.broadcast %22 : f32 to vector<8x1xf32>
    %c1_i32_4 = arith.constant 1 : i32
    %24 = vector.broadcast %c1_i32_4 : i32 to vector<8x1xi32>
    %25 = arith.cmpi eq, %19, %24 : vector<8x1xi32>
    %c1 = arith.constant 1 : index
    %26 = memref.load %arg2[%c1] : memref<3xf32, #tpu.memory_space<smem>>
    %27 = vector.broadcast %26 : f32 to vector<8x1xf32>
    %28 = arith.select %25, %27, %21 : vector<8x1xi1>, vector<8x1xf32>
    %c1_5 = arith.constant 1 : index
    %29 = memref.load %arg3[%c1_5] : memref<3xf32, #tpu.memory_space<smem>>
    %30 = vector.broadcast %29 : f32 to vector<8x1xf32>
    %31 = arith.select %25, %30, %23 : vector<8x1xi1>, vector<8x1xf32>
    %c2_i32 = arith.constant 2 : i32
    %32 = vector.broadcast %c2_i32 : i32 to vector<8x1xi32>
    %33 = arith.cmpi eq, %19, %32 : vector<8x1xi32>
    %c2 = arith.constant 2 : index
    %34 = memref.load %arg2[%c2] : memref<3xf32, #tpu.memory_space<smem>>
    %35 = vector.broadcast %34 : f32 to vector<8x1xf32>
    %36 = arith.select %33, %35, %28 : vector<8x1xi1>, vector<8x1xf32>
    %c2_6 = arith.constant 2 : index
    %37 = memref.load %arg3[%c2_6] : memref<3xf32, #tpu.memory_space<smem>>
    %38 = vector.broadcast %37 : f32 to vector<8x1xf32>
    %39 = arith.select %33, %38, %31 : vector<8x1xi1>, vector<8x1xf32>
    %c0_7 = arith.constant 0 : index
    %c0_8 = arith.constant 0 : index
    %40 = vector.load %arg4[%c0_7, %c0_8] : memref<8x128xf32, #tpu.memory_space<vmem>>, vector<8x128xf32>
    %41 = vector.broadcast %36 : vector<8x1xf32> to vector<8x128xf32>
    %42 = arith.mulf %40, %41 : vector<8x128xf32>
    %43 = vector.broadcast %39 : vector<8x1xf32> to vector<8x128xf32>
    %44 = arith.addf %42, %43 : vector<8x128xf32>
    %c0_9 = arith.constant 0 : index
    %c0_10 = arith.constant 0 : index
    %45 = vector.load %arg5[%c0_9, %c0_10] : memref<8x128xf32, #tpu.memory_space<vmem>>, vector<8x128xf32>
    tpu.vector_store %arg5[%c0_9, %c0_10], %44 {strides = array<i32>} : memref<8x128xf32, #tpu.memory_space<vmem>>, vector<8x128xf32>,
    return
  }
  func.func @transform_0(%arg0: i32, %arg1: i32) -> i32 {
    %c0_i32 = arith.constant 0 : i32
    %c0_i32_0 = arith.constant 0 : i32
    return %c0_i32 : i32
  }
  func.func @transform_1(%arg0: i32, %arg1: i32) -> i32 {
    %c0_i32 = arith.constant 0 : i32
    %c0_i32_0 = arith.constant 0 : i32
    return %c0_i32 : i32
  }
  func.func @transform_2(%arg0: i32, %arg1: i32) -> (i32, i32) {
    %c0_i32 = arith.constant 0 : i32
    return %arg0, %arg1 : i32, i32
  }
  func.func @transform_3(%arg0: i32, %arg1: i32) -> (i32, i32) {
    %c0_i32 = arith.constant 0 : i32
    return %arg0, %arg1 : i32, i32
  }
}

</mosaic_0001>

<bundles_post_ra>
// kernel: tpu_custom_call.1
= control target key start
LH: loop header
LB: loop body
LE: loop exit
PB: predicated region body
PF: predicated region fallthrough
CT: control target
= control target key end

     0   :  { %8 = vsyncpa [#allocation5], 0  ;;  %s905_s0 = inlined_call_operand.hbm [shape: f32[3], index: 0, kind: input, shape index: {}]   ;;  %s906_s1 = inlined_call_operand.vmem [shape: f32[3], index: 1, kind: input, shape index: {}]   ;;  %s907_s2 = inlined_call_operand.hbm [shape: f32[6,256], index: 2, kind: input, shape index: {}]   ;;  %s908_s3 = inlined_call_operand.hbm [shape: f32[6,256], index: 3, kind: output, shape index: {}]  }
   0x1   :  { %9 = vsyncpa [#allocation6], 0 }
   0x2   :  { %10 = vsyncpa [#allocation3], 0 }
   0x3   :  { %12 = vsyncpa [#allocation3 + $0x1], 0 }
   0x4   :  { %13 = vsyncpa [#allocation4], 0 }
   0x5   :  { %15 = vsyncpa [#allocation4 + $0x1], 0  ;;  %s674_s12 = smov 0   ;;  %s676_s13 = smov 0  }
   0x6   :  { %s678_s14 = smov 0   ;;  %s680_s15 = smov 0  }
   0x7   :  { %s682_s16 = smov 0   ;;  %s684_s17 = smov 0  }
   0x8 LB: > { %s394_s18 = sadd.s32 4294967295, %s648_s17   ;;  %s395_s19 = sadd.s32 4294967294, %s648_s17   ;;  %s648_s17 = sphi %s684_s17, %s21_s17   ;;  %s644_s16 = sphi %s682_s16, %s931_s16   ;;  %s640_s15 = sphi %s680_s15, %s930_s15   ;;  %s636_s14 = sphi %s678_s14, %s929_s14   ;;  %s632_s13 = sphi %s676_s13, %s928_s13   ;;  %s628_s12 = sphi %s674_s12, %s927_s12  }
   0x9   : > { %p97_p0 = scmp.ne.s32.totalorder %s632_s13, %s628_s12  ;;  %p708_p1 = scmp.eq.s32.totalorder %s394_s18, 0 }
   0xa   : > { %p712_p2 = scmp.eq.s32.totalorder %s394_s18, 1  ;;  %p129_p3 = scmp.eq.s32.totalorder %s395_s19, 1 }
   0xb   : > { %s913_s20 = scalar_select %p708_p1, 1, 0 }
   0xc   : > { %p718_p4 = por %p708_p1, %p97_p0  ;;  %p396_p5 = scmp.ge.s32.totalorder %s648_s17, 1 }
   0xd   : > { %p723_p6 = por %p129_p3, %p97_p0  ;;  %p136_p7 = scmp.lt.s32.totalorder %s648_s17, 3 }
   0xe   : > { %s915_s22 = scalar_select %p718_p4, 1, 0 }
   0xf   : > { %s916_s23 = scalar_select %p723_p6, 1, 0 }
  0x10   : > { %p728_p8 = pnand %p396_p5, %p136_p7  ;;  %s158_s27 = sshll.u32 %s906_s1, 4  ;;  %s159_s27 = int_to_ptr.vmem [resolvable:$true] %s158_s27 }
  0x11   : > { %s30_s29 = sadd.s32 1, %s644_s16  ;;  %s500_s6 = scalar_lea.hbm %s905_s0, 16 }
  0x12   : > { %s917_s24 = scalar_select %p728_p8, 1, 0 }
  0x13   : > { %p429_p10 = pneg %p728_p8  ;;  %p745_p12 = scmp.ge.s32.totalorder %s30_s29, 2 }
  0x14   : > { %p501_p13 = scmp.ne.s32.totalorder %s905_s0, %s500_s6  ;;  %p507_p7 = scmp.lt.u32.totalorder %s500_s6, %s905_s0 }
  0x15   : > { %p740_p11 = pnand %p429_p10, %p708_p1 }
  0x17   : > { %p502_p0 = pneg %p740_p11 }
  0x19   : > { %p503_p3 = pnand %p502_p0, %p501_p13 }
  0x1b   : > { %p504_p5 = pneg %p503_p3 }
  0x1d   : > { %p509_p10 = pnand %p507_p7, %p504_p5 }
  0x1f   : > { %512 = shalt.err (!%p509_p10)
}
  0x20   : > { %s650_s11 = smov [#allocation2]   ;;  %s513_s25 = scalar_lea.vmem %s159_s27, 16 }
  0x21   : > { %432 = dma.hbm_to_smem (!%p740_p11), %s905_s0, 16, %s650_s11, [#allocation5]  }
  0x22   : > { %p514_p9 = scmp.ne.s32.totalorder %s159_s27, %s513_s25  ;;  %p521_p1 = scmp.lt.s32.totalorder %s159_s27, %s159_s27 }
  0x23   : > { %p522_p13 = scmp.lt.s32.totalorder %s513_s25, %s513_s25 }
  0x24   : > { %p516_p6 = pnand %p514_p9, %p502_p0 }
  0x25   : > { %p523_p3 = por %p522_p13, %p521_p1 }
  0x26   : > { %p517_p4 = pneg %p516_p6 }
  0x28   : > { %p524_p8 = pnand %p523_p3, %p517_p4 }
  0x2a   : > { %527 = shalt.err (!%p524_p8)
}
  0x2b   : > { %s651_s26 = smov [#allocation7]   ;;  %s933_s29 = smov (%p745_p12, %s30_s29), 0 }
  0x2c   : > { %435 = dma.vmem_to_smem (!%p740_p11), %s159_s27, 16, %s651_s26, [#allocation6]  }
  0x2d   : > { %s84_s4 = sadd.s32 1, %s636_s14  ;;  %p91_p1 = scmp.ne.s32.totalorder %s636_s14, %s632_s13 }
  0x2e   : > { %s80_s5 = ssub.s32 %s644_s16, %s933_s29  ;;  %p92_p4 = scmp.eq.s32.totalorder %s648_s17, 0 }
  0x2f   : > { %p82_p6 = scmp.eq.s32.totalorder %s80_s5, 0  ;;  %p779_p8 = por %p712_p2, %p91_p1 }
  0x30   : > { %p93_p9 = por %p92_p4, %p91_p1  ;;  %p446_p0 = scmp.lt.s32.totalorder %s648_s17, 2 }
  0x31   : > { %s785_s6 = scalar_select %p82_p6, %s636_s14, %s84_s4  }
  0x32   : > { %s169_s7 = sand.u32 1, %s636_s14   ;;  %s401_s27 = sshll.u32 %s644_s16, 7 }
  0x33   : > { %s400_s30 = sshll.u32 %s169_s7, 3  ;;  %s792_s10 = scalar_lea.hbm %s907_s2, %s401_s27 }
  0x34   : > { %s173_s21 = scalar_lea.vmem [#allocation8], %s400_s30  ;;  %p794_p2 = pnand %p446_p0, %p93_p9 }
  0x35   : > { %s182_s11 = sshll.u32 %s173_s21, 4  ;;  %s170_s19 = scalar_lea.sflag [#allocation3], %s169_s7  ;;  %s798_s11 = int_to_ptr.vmem [resolvable:$true] %s182_s11 }
  0x36   : > { %s528_s25 = scalar_lea.hbm %s792_s10, 128  ;;  %p530_p12 = pneg %p794_p2 }
  0x37   : > { %p529_p11 = scmp.ne.s32.totalorder %s792_s10, %s528_s25  ;;  %s533_s5 = scalar_lea.hbm %s907_s2, 256 }
  0x38   : > { %p534_p10 = scmp.lt.u32.totalorder %s792_s10, %s907_s2  ;;  %p535_p13 = scmp.lt.u32.totalorder %s533_s5, %s528_s25 }
  0x39   : > { %p531_p5 = pnand %p530_p12, %p529_p11  ;;  %p537_p1 = scmp.lt.u32.totalorder %s528_s25, %s792_s10 }
  0x3a   : > { %p536_p3 = por %p535_p13, %p534_p10 }
  0x3b   : > { %p532_p7 = pneg %p531_p5 }
  0x3c   : > { %p538_p4 = por %p537_p1, %p536_p3 }
  0x3e   : > { %p539_p6 = pnand %p538_p4, %p532_p7 }
  0x40   : > { %542 = shalt.err (!%p539_p6)
}
  0x41   : > { %s543_s7 = scalar_lea.vmem %s798_s11, 128  ;;  %s652_s8 = smov [#allocation8]  }
  0x42   : > { %p544_p9 = scmp.ne.s32.totalorder %s798_s11, %s543_s7  ;;  %s548_s9 = sshll.u32 %s652_s8, 4  ;;  %s549_s9 = int_to_ptr.vmem [resolvable:$false] %s548_s9 }
  0x43   : > { %s550_s21 = scalar_lea.vmem %s549_s9, 256  ;;  %p551_p5 = scmp.lt.s32.totalorder %s798_s11, %s549_s9 }
  0x44   : > { %p546_p0 = pnand %p544_p9, %p530_p12  ;;  %p552_p10 = scmp.lt.s32.totalorder %s550_s21, %s543_s7 }
  0x46   : > { %p547_p11 = pneg %p546_p0  ;;  %p553_p13 = por %p552_p10, %p551_p5 }
  0x48   : > { %p554_p3 = pnand %p553_p13, %p547_p11 }
  0x4a   : > { %557 = shalt.err (!%p554_p3)
}
  0x4b   : > { %439 = dma.hbm_to_vmem [thread:$0]  (!%p794_p2), %s792_s10, 128, %s798_s11, %s170_s19  }
  0x4c   : > { %p922_p7 = scmp.ne.s32.totalorder %s917_s24, 0 }
  0x4d   : > { %p923_p12 = scmp.ne.s32.totalorder (!%p922_p7), %s913_s20, 0 }
  0x4e   : > { %191 = sbr.rel (%p922_p7) target bundleno = 130 (0x82), region = 32 }
  0x55   : > { %611 = dma.done.wait (%p923_p12), [#allocation5], 16  }
  0x56   : > { %613 = vsyncadd (%p923_p12), [#allocation5], 4294967280 }
  0x57   : > { %615 = dma.done.wait (%p923_p12), [#allocation6], 16  }
  0x58   : > { %617 = vsyncadd (%p923_p12), [#allocation6], 4294967280  ;;  %s836_s18 = sand.u32 1, %s632_s13   ;;  %p924_p2 = scmp.ne.s32.totalorder %s915_s22, 0 }
  0x59   : > { %s405_s24 = sshll.u32 %s836_s18, 3  ;;  %s202_s10 = scalar_lea.sflag [#allocation3], %s836_s18 }
  0x5a   : > { %s205_s11 = scalar_lea.vmem [#allocation8], %s405_s24 }
  0x5b   : > { %619 = dma.done.wait (%p924_p2), %s202_s10, 128  }
  0x5c   : > { %621 = vsyncadd (%p924_p2), %s202_s10, 4294967168 }
  0x5d   : > { %210 = sfence }
  0x5e   : > { %v230_v0 = vlaneseq  ;;  %s250_s20 = sld [smem:[#allocation2]]  ;;  %s407_s25 = sld [smem:[#allocation2 + $0x1]]  ;;  %v268_v15 = vld [vmem:[%s205_s11] sm:$0xff] }
  0x5f   : > { %s252_s19 = sld [smem:[#allocation7]]  ;;  %s408_s26 = sld [smem:[#allocation7 + $0x1]] }
  0x60   : > { %v231_v1 = vshrl.u32 %v230_v0, 7  ;;  %s409_s4 = sld [smem:[#allocation2 + $0x2]]  ;;  %s228_s22 = scalar_lea.vmem [#allocation9], %s405_s24 }
  0x61   : > { %s410_s5 = sld [smem:[#allocation7 + $0x2]]  ;;  %s288_s27 = sshll.u32 %s228_s22, 4  ;;  %s853_s27 = int_to_ptr.vmem [resolvable:$true] %s288_s27 }
  0x62   : > { %v846_v2 = vmul.u32.u64.low 2863311531, %v231_v1  ;;  %v847_v3 = vmul.u32.u64.high 2863311531, %v231_v1, %v846_v2  ;;  %s412_s30 = sshll.u32 %s640_s15, 7  ;;  %s273_s21 = scalar_lea.sflag [#allocation4], %s836_s18 }
  0x63   : > { %s858_s9 = scalar_lea.hbm %s908_s3, %s412_s30  ;;  %s558_s10 = scalar_lea.vmem %s853_s27, 128 }
  0x64   : > { %v240_v4 = vshrl.u32 %v847_v3, 1  ;;  %v251_v8 = vstv %s250_s20  ;;  %v256_v10 = vstv %s407_s25  ;;  %p559_p1 = scmp.ne.s32.totalorder %s853_s27, %s558_s10  ;;  %s653_s15 = smov [#allocation9]  }
  0x65   : > { %v253_v9 = vstv %s252_s19  ;;  %v259_v11 = vstv %s408_s26  ;;  %s562_s24 = sshll.u32 %s653_s15, 4  ;;  %s563_s24 = int_to_ptr.vmem [resolvable:$false] %s562_s24 }
  0x66   : > { %v241_v5 = vmul.u32 3, %v240_v4  ;;  %v263_v13 = vstv %s409_s4  ;;  %p560_p4 = pnand %p559_p1, %p779_p8  ;;  %s564_s11 = scalar_lea.vmem %s563_s24, 256 }
  0x67   : > { %v266_v14 = vstv %s410_s5  ;;  %p565_p9 = scmp.lt.s32.totalorder %s853_s27, %s563_s24  ;;  %p566_p0 = scmp.lt.s32.totalorder %s564_s11, %s558_s10 }
  0x68   : > { %v242_v6 = vsub.s32 %v231_v1, %v241_v5  ;;  %p561_p6 = pneg %p560_p4 }
  0x69   : > { %p567_p11 = por %p566_p0, %p565_p9 }
  0x6a   : > { %vm245_vm0 = vcmp.ne.s32.totalorder %v242_v6, 0  ;;  %vm246_vm1 = vcmp.lt.s32.totalorder %v242_v6, 0  ;;  %v248_v7 = vadd.s32 3, %v242_v6 }
  0x6b   : > { %vm247_vm2 = vmand %vm246_vm1, %vm245_vm0  ;;  %p568_p5 = pnand %p567_p11, %p561_p6 }
  0x6c   : > { %v249_v12 = vsel %vm247_vm2, %v248_v7, %v242_v6 }
  0x6d   : > { %vm254_vm3 = vcmp.eq.s32.totalorder %v249_v12, 1  ;;  %vm261_vm4 = vcmp.eq.s32.totalorder %v249_v12, 2 }
  0x6e   : > { %v257_v16 = vsel %vm254_vm3, %v256_v10, %v251_v8  ;;  %v260_v17 = vsel %vm254_vm3, %v259_v11, %v253_v9 }
  0x6f   : > { %v264_v18 = vsel %vm261_vm4, %v263_v13, %v257_v16  ;;  %v267_v19 = vsel %vm261_vm4, %v266_v14, %v260_v17 }
  0x70   : > { %v269_v20 = vmul.f32 %v268_v15, %v264_v18 }
  0x72   : > { %v270_v21 = vadd.f32 %v269_v20, %v267_v19 }
  0x74   : > { %271 = vst [vmem:[%s228_s22] sm:$0xff] %v270_v21 }
  0x75   : > { %571 = shalt.err (!%p568_p5)
}
  0x76   : > { %s572_s18 = scalar_lea.hbm %s858_s9, 128  ;;  %s576_s25 = scalar_lea.hbm %s908_s3, 256 }
  0x77   : > { %p573_p10 = scmp.ne.s32.totalorder %s858_s9, %s572_s18  ;;  %p577_p7 = scmp.lt.u32.totalorder %s858_s9, %s908_s3 }
  0x78   : > { %p578_p12 = scmp.lt.u32.totalorder %s576_s25, %s572_s18  ;;  %p580_p1 = scmp.lt.u32.totalorder %s572_s18, %s858_s9 }
  0x79   : > { %p574_p13 = pnand %p573_p10, %p779_p8 }
  0x7a   : > { %p579_p2 = por %p578_p12, %p577_p7 }
  0x7b   : > { %p575_p3 = pneg %p574_p13 }
  0x7c   : > { %p581_p4 = por %p580_p1, %p579_p2 }
  0x7e   : > { %p582_p6 = pnand %p581_p4, %p575_p3 }
  0x80   : > { %585 = shalt.err (!%p582_p6)
}
  0x81   : > { %427 = dma.vmem_to_hbm [thread:$0]  (%p779_p8), %s853_s27, 128, %s858_s9, %s273_s21  }
  0x82 PF: > { %s300_s5 = sand.u32 1, %s628_s12   ;;  %p925_p9 = scmp.ne.s32.totalorder %s916_s23, 0 }
  0x83   : > { %p926_p0 = scmp.ge.s32.totalorder %s648_s17, 2  ;;  %s301_s22 = scalar_lea.sflag [#allocation4], %s300_s5 }
  0x85   : > { %p441_p11 = pnand %p926_p0, %p925_p9 }
  0x87   : > { %623 = dma.done.wait (!%p441_p11), %s301_s22, 128  }
  0x88   : > { %625 = vsyncadd (!%p441_p11), %s301_s22, 4294967168  ;;  %s21_s17 = sadd.s32 1, %s648_s17   ;;  %s927_s12 = smov %s632_s13 }
  0x89   : > { %p18_p5 = scmp.ge.s32.totalorder %s21_s17, 4   ;;  %s928_s13 = smov %s636_s14 }
  0x8a   : > { %s929_s14 = smov %s785_s6  ;;  %s930_s15 = smov %s644_s16 }
  0x8b   : > { %s931_s16 = smov %s933_s29  ;;  %20 = sbr.rel (!%p18_p5) target bundleno = 8 (0x8), region = 87 }
  0x92   :  { %306 = vsyncpa [#allocation3], 1 }
  0x93   :  { %308 = vsyncpa [#allocation3 + $0x1], 1 }
  0x94   :  { %309 = vsyncpa [#allocation4], 1 }
  0x95   :  { %311 = vsyncpa [#allocation4 + $0x1], 1 }
  0x96   :  { %312 = vsyncpa [#allocation5], 1 }
  0x97   :  { %314 = vsyncpa [#allocation5 + $0x1], 1 }
  0x98   :  { %315 = vsyncpa [#allocation6], 1 }
  0x99   :  { %317 = vsyncpa [#allocation6 + $0x1], 1 }

</bundles_post_ra>
